<compile_context>
chip_gen: v7x
topology: tpu7x:2x2x1
jax: 0.10.0
libtpu: 0.0.40
codegen_flags: <defaults>
</compile_context>

<pallas_src>
import functools

import jax
import jax.numpy as jnp
from jax.experimental import pallas as pl
from jax.experimental.pallas import tpu as pltpu


_KP = 128  # lane width of the folded score matmul (one vreg of lanes)


def _round_up(x, m):
    return ((x + m - 1) // m) * m


def _attention_select_kernel(c_ref, s_ref, w_ref, sw_ref, drop_ref, sel_ref,
                             *, K, dim):
    """Per row-tile: score K candidates, argmin (dropped), compact the kept k.

    c_ref  : (TR, K*dim) f32   row-flattened Candidate
    s_ref  : (TR, K)     f32   side = g[neigh_ind] + rowscalar (per-row constant)
    w_ref  : (K*dim, 128) f32  block-diagonal folded candidate weight (cols >= K are 0)
    sw_ref : (K, 128)    f32   "identity" broadcast weight for the side term
    drop_ref: (TR, 1)    int32 per-row argmin (candidate that gets dropped)
    sel_ref : (TR, (K-1)*dim) f32  order-preserving compaction of kept candidates
    """
    c = c_ref[...]                                                     # (TR, K*dim)

    # Candidate score + side term, both kept 128-lane wide (MXU friendly, no
    # sub-lane relayouts).  Columns >= K are exactly zero by construction.
    scores = jnp.dot(c, w_ref[...], preferred_element_type=jnp.float32)
    scores = scores + jnp.dot(s_ref[...], sw_ref[...],
                              preferred_element_type=jnp.float32)      # (TR, 128)

    # First-index argmin over the K valid columns (padded lanes masked to +inf).
    col = jax.lax.broadcasted_iota(jnp.int32, scores.shape, 1)         # (TR, 128)
    masked = jnp.where(col < K, scores, jnp.inf)
    mn = jnp.min(masked, axis=1, keepdims=True)                        # (TR, 1)
    colf = col.astype(jnp.float32)
    droppedf = jnp.min(jnp.where(masked <= mn, colf, jnp.float32(_KP)),
                       axis=1, keepdims=True)                          # (TR, 1)
    dropped = droppedf.astype(jnp.int32)                               # (TR, 1)
    drop_ref[...] = dropped

    # Order-preserving compaction of the kept k = K-1 candidates:
    #   out[r, t*dim + d] = Candidate[r, t + (t >= dropped[r]), d]
    # == where(flat_pos < dropped*dim, c[:, :k*dim], c[:, dim:dim+k*dim])
    kd = (K - 1) * dim
    keep_lo = c[:, :kd]
    keep_hi = c[:, dim:dim + kd]
    pos = jax.lax.broadcasted_iota(jnp.int32, keep_lo.shape, 1)
    sel_ref[...] = jnp.where(pos < dropped * dim, keep_lo, keep_hi)


def attention_select_pallas(Cflat, side, wa2_top, K, dim, tile_rows=4096):
    """Returns (dropped (no,) int32, Candidate_sel_flat (no, (K-1)*dim) f32)."""
    no = Cflat.shape[0]
    kd = (K - 1) * dim

    # Folded candidate weight: w[j*dim + d, j] = wa2_top[d]; zero elsewhere.
    col = jnp.arange(_KP)
    blk = (jnp.arange(K)[:, None] == col[None, :]).astype(jnp.float32)       # (K, KP)
    w = (blk[:, None, :] * wa2_top[None, :, None]).reshape(K * dim, _KP)     # (K*dim, KP)
    sw = blk                                                                  # (K, KP)

    # Row tiling: large tiles for HBM-roofline, but keep >= 2 grid steps so both
    # v7x TensorCores get work (dimension_semantics=("parallel",)).
    half = _round_up(pl.cdiv(no, 2), 8)
    tr = max(8, min(_round_up(tile_rows, 8), half))
    no_pad = _round_up(no, tr)
    if no_pad != no:
        pad = ((0, no_pad - no), (0, 0))
        Cflat = jnp.pad(Cflat, pad)
        side = jnp.pad(side, pad)

    grid = (no_pad // tr,)
    kernel = functools.partial(_attention_select_kernel, K=K, dim=dim)

    dropped_pad, sel_pad = pl.pallas_call(
        kernel,
        out_shape=(jax.ShapeDtypeStruct((no_pad, 1), jnp.int32),
                   jax.ShapeDtypeStruct((no_pad, kd), jnp.float32)),
        grid=grid,
        in_specs=[
            pl.BlockSpec((tr, K * dim), lambda i: (i, 0)),   # Candidate (flattened)
            pl.BlockSpec((tr, K), lambda i: (i, 0)),         # side term
            pl.BlockSpec((K * dim, _KP), lambda i: (0, 0)),  # folded weight
            pl.BlockSpec((K, _KP), lambda i: (0, 0)),        # side broadcast weight
        ],
        out_specs=(pl.BlockSpec((tr, 1), lambda i: (i, 0)),
                   pl.BlockSpec((tr, kd), lambda i: (i, 0))),
        compiler_params=pltpu.CompilerParams(
            dimension_semantics=("parallel",),      # shard row tiles across TCs
            vmem_limit_bytes=32 * 1024 * 1024,      # safe on v5e/v6e/v7x
        ),
    )(Cflat, side, w, sw)

    return dropped_pad[:no, 0], sel_pad[:no]


def attention_layer_forward(X, Candidate, neigh_dist, neigh_ind,
                            data_m_train, data_m_batch, W, a_param,
                            k_neighbors, tile_rows=4096):
    no, dim = X.shape
    K = Candidate.shape[1]
    out_features = W.shape[1]
    assert K == k_neighbors + 1, "reference semantics require K = k_neighbors + 1"
    assert K <= _KP, "candidate pool wider than 128 lanes is not supported"

    # Fold the attention vector into W:  (X @ W) @ a == X @ (W @ a).
    Wa1 = (W @ a_param[:out_features])[:, 0]                   # (2*dim,)
    Wa2 = (W @ a_param[out_features:2 * out_features])[:, 0]   # (2*dim,)

    # Per-row constant term (cannot change the per-row ranking, kept for fidelity).
    rowscalar = X @ Wa1[:dim] + data_m_batch @ Wa1[dim:]       # (no,)

    # data_m_candidate is never materialized: only its per-train-row projections
    # are needed for the scores (g) and for the a/b scalar means (h).
    g = data_m_train @ Wa2[dim:]                               # (N_train,)
    h = jnp.sum(data_m_train, axis=1)                          # (N_train,)
    gni = g[neigh_ind]                                         # (no, K)
    hni = h[neigh_ind]                                         # (no, K)
    side = gni + rowscalar[:, None]                            # (no, K)

    dropped, cand_sel_flat = attention_select_pallas(
        Candidate.reshape(no, K * dim), side, Wa2[:dim], K, dim,
        tile_rows=tile_rows)

    k = k_neighbors
    Candidate_sel = cand_sel_flat.reshape(no, k, dim)

    # Small (no, K) gathers / reductions stay in XLA (negligible traffic).
    t = jnp.arange(k)[None, :]
    sel = t + (t >= dropped[:, None]).astype(jnp.int32)        # (no, k)
    row = jnp.arange(no)[:, None]
    nd_sel = neigh_dist[row, sel]                              # (no, k)
    ni_sel = neigh_ind[row, sel]                               # (no, k)

    hd = hni[jnp.arange(no), dropped]                          # (no,)
    b_scalar = jnp.sum(hd) / no
    a_scalar = (jnp.sum(hni) - jnp.sum(hd)) / (no * k)
    return Candidate_sel, nd_sel, ni_sel, a_scalar, b_scalar


def xavier_uniform(key, shape):
    fan_in, fan_out = shape[0], shape[1]
    bound = (6.0 / (fan_in + fan_out)) ** 0.5
    return jax.random.uniform(key, shape, minval=-bound, maxval=bound,
                              dtype=jnp.float32)


def reference_forward(X, Candidate, neigh_dist, neigh_ind,
                      data_m_train, data_m_batch, W, a_param, k_neighbors):
    """Pure-JAX transcription of the PyTorch module (topk == drop the row min)."""
    no, dim = X.shape
    K = Candidate.shape[1]
    out = W.shape[1]
    dmc = data_m_train[neigh_ind]                                   # (no, K, dim)
    WX = jnp.concatenate([X, data_m_batch], axis=1) @ W             # (no, out)
    WC = jnp.concatenate([Candidate, dmc], axis=2) @ W              # (no, K, out)
    e = (WX @ a_param[:out, 0])[:, None] + WC @ a_param[out:2 * out, 0]
    dropped = jnp.argmin(e, axis=1)
    t = jnp.arange(k_neighbors)[None, :]
    sel = t + (t >= dropped[:, None]).astype(jnp.int32)
    row = jnp.arange(no)[:, None]
    C_sel = Candidate[row, sel]
    dmc0 = dmc[row, sel]
    dmc1 = dmc[jnp.arange(no), dropped]
    a = jnp.sum(dmc0) / (no * k_neighbors)
    b = jnp.sum(dmc1) / no
    return C_sel, neigh_dist[row, sel], neigh_ind[row, sel], a, b


if __name__ == "__main__":
    # Small, deterministic example shapes
    in_features = 8        # dim
    out_features = 16
    k_neighbors = 4
    K = k_neighbors + 1    # candidate pool size per row
    no = 8                 # batch of query points
    N_train = 32

    key = jax.random.PRNGKey(0)
    keys = jax.random.split(key, 8)

    W = xavier_uniform(keys[0], (2 * in_features, out_features))     # (2*dim, out)
    a_param = xavier_uniform(keys[1], (2 * out_features, 1))         # (2*out, 1)

    X = jax.random.normal(keys[2], (no, in_features), dtype=jnp.float32)
    Candidate = jax.random.normal(keys[3], (no, K, in_features), dtype=jnp.float32)
    neigh_dist = jax.random.uniform(keys[4], (no, K), dtype=jnp.float32)
    neigh_ind = jax.random.randint(keys[5], (no, K), 0, N_train, dtype=jnp.int32)
    data_m_train = jax.random.bernoulli(
        keys[6], 0.5, (N_train, in_features)).astype(jnp.float32)
    data_m_batch = jax.random.bernoulli(
        keys[7], 0.5, (no, in_features)).astype(jnp.float32)

    # TODO(synk): `test` flag of the reference forward is unused there; omitted.
    fwd = jax.jit(functools.partial(attention_layer_forward,
                                    k_neighbors=k_neighbors))
    outs = fwd(X, Candidate, neigh_dist, neigh_ind,
               data_m_train, data_m_batch, W, a_param)
    outs = jax.block_until_ready(outs)

    Cand_sel, nd_sel, ni_sel, a_s, b_s = outs
    assert Cand_sel.shape == (no, k_neighbors, in_features)
    assert nd_sel.shape == (no, k_neighbors)
    assert ni_sel.shape == (no, k_neighbors)
    assert a_s.shape == () and b_s.shape == ()

    # Correctness check against a pure-JAX transcription of the module.
    ref = reference_forward(X, Candidate, neigh_dist, neigh_ind,
                            data_m_train, data_m_batch, W, a_param, k_neighbors)
    ref = jax.block_until_ready(ref)
    assert jnp.allclose(Cand_sel, ref[0], atol=1e-5, rtol=1e-4)
    assert jnp.allclose(nd_sel, ref[1], atol=1e-5, rtol=1e-4)
    assert jnp.array_equal(ni_sel, ref[2])
    assert jnp.allclose(a_s, ref[3], atol=1e-5, rtol=1e-4)
    assert jnp.allclose(b_s, ref[4], atol=1e-5, rtol=1e-4)

    print("KERNEL_OK")
</pallas_src>

<mosaic_0001>
module attributes {stable_mosaic.version = 11 : i64} {
  func.func @_attention_select_kernel(%arg0: i32, %arg1: memref<8x40xf32, #tpu.memory_space<vmem>>, %arg2: memref<8x5xf32, #tpu.memory_space<vmem>>, %arg3: memref<40x128xf32, #tpu.memory_space<vmem>>, %arg4: memref<5x128xf32, #tpu.memory_space<vmem>>, %arg5: memref<8x1xi32, #tpu.memory_space<vmem>>, %arg6: memref<8x32xf32, #tpu.memory_space<vmem>>) attributes {dimension_semantics = [#tpu.dimension_semantics<parallel>], iteration_bounds = array<i64: 1>, scalar_prefetch = 0 : i64, scratch_operands = 0 : i64, tpu.core_type = #tpu.core_type<tc>, window_params = [{transform_indices = @transform_0, window_bounds = array<i64: 8, 40>}, {transform_indices = @transform_1, window_bounds = array<i64: 8, 5>}, {pipeline_mode = #tpu.pipeline_mode<synchronous>, transform_indices = @transform_2, window_bounds = array<i64: 40, 128>}, {pipeline_mode = #tpu.pipeline_mode<synchronous>, transform_indices = @transform_3, window_bounds = array<i64: 5, 128>}, {transform_indices = @transform_4, window_bounds = array<i64: 8, 1>}, {transform_indices = @transform_5, window_bounds = array<i64: 8, 32>}]} {
    %c0 = arith.constant 0 : index
    %c0_0 = arith.constant 0 : index
    %0 = vector.load %arg1[%c0, %c0_0] : memref<8x40xf32, #tpu.memory_space<vmem>>, vector<8x40xf32>
    %c0_1 = arith.constant 0 : index
    %c0_2 = arith.constant 0 : index
    %1 = vector.load %arg3[%c0_1, %c0_2] : memref<40x128xf32, #tpu.memory_space<vmem>>, vector<40x128xf32>
    %cst = arith.constant dense<0.000000e+00> : vector<8x128xf32>
    %2 = tpu.matmul %0, %1, %cst {dimension_numbers = #tpu.dot_dimension_numbers<[1], [0], [0], [1], [0, 0, 1, 1], [], []>} : vector<8x40xf32>, vector<40x128xf32>, vector<8x128xf32> -> vector<8x128xf32>
    %c0_3 = arith.constant 0 : index
    %c0_4 = arith.constant 0 : index
    %3 = vector.load %arg2[%c0_3, %c0_4] : memref<8x5xf32, #tpu.memory_space<vmem>>, vector<8x5xf32>
    %c0_5 = arith.constant 0 : index
    %c0_6 = arith.constant 0 : index
    %4 = vector.load %arg4[%c0_5, %c0_6] : memref<5x128xf32, #tpu.memory_space<vmem>>, vector<5x128xf32>
    %cst_7 = arith.constant dense<0.000000e+00> : vector<8x128xf32>
    %5 = tpu.matmul %3, %4, %cst_7 {dimension_numbers = #tpu.dot_dimension_numbers<[1], [0], [0], [1], [0, 0, 1, 1], [], []>} : vector<8x5xf32>, vector<5x128xf32>, vector<8x128xf32> -> vector<8x128xf32>
    %6 = arith.addf %2, %5 : vector<8x128xf32>
    %7 = tpu.iota {dimensions = array<i32: 1>} : vector<8x128xi32>
    %c5_i32 = arith.constant 5 : i32
    %8 = vector.broadcast %c5_i32 : i32 to vector<8x128xi32>
    %9 = arith.cmpi slt, %7, %8 : vector<8x128xi32>
    %cst_8 = arith.constant 0x7F800000 : f32
    %10 = vector.broadcast %cst_8 : f32 to vector<8x128xf32>
    %11 = arith.select %9, %6, %10 : vector<8x128xi1>, vector<8x128xf32>
    %cst_9 = arith.constant dense<0x7F800000> : vector<8xf32>
    %12 = vector.multi_reduction <minimumf>, %11, %cst_9 [1] : vector<8x128xf32> to vector<8xf32>
    %13 = vector.shape_cast %12 : vector<8xf32> to vector<8x1xf32>
    %14 = arith.sitofp %7 : vector<8x128xi32> to vector<8x128xf32>
    %15 = vector.broadcast %13 : vector<8x1xf32> to vector<8x128xf32>
    %16 = arith.cmpf ole, %11, %15 : vector<8x128xf32>
    %cst_10 = arith.constant 1.280000e+02 : f32
    %17 = vector.broadcast %cst_10 : f32 to vector<8x128xf32>
    %18 = arith.select %16, %14, %17 : vector<8x128xi1>, vector<8x128xf32>
    %cst_11 = arith.constant dense<0x7F800000> : vector<8xf32>
    %19 = vector.multi_reduction <minimumf>, %18, %cst_11 [1] : vector<8x128xf32> to vector<8xf32>
    %20 = vector.shape_cast %19 : vector<8xf32> to vector<8x1xf32>
    %21 = arith.fptosi %20 : vector<8x1xf32> to vector<8x1xi32>
    %c0_12 = arith.constant 0 : index
    %c0_13 = arith.constant 0 : index
    %22 = vector.load %arg5[%c0_12, %c0_13] : memref<8x1xi32, #tpu.memory_space<vmem>>, vector<8x1xi32>
    tpu.vector_store %arg5[%c0_12, %c0_13], %21 {strides = array<i32>} : memref<8x1xi32, #tpu.memory_space<vmem>>, vector<8x1xi32>,
    %23 = vector.extract_strided_slice %0 {offsets = [0, 0], sizes = [8, 32], strides = [1, 1]} : vector<8x40xf32> to vector<8x32xf32>
    %24 = vector.extract_strided_slice %0 {offsets = [0, 8], sizes = [8, 32], strides = [1, 1]} : vector<8x40xf32> to vector<8x32xf32>
    %25 = tpu.iota {dimensions = array<i32: 1>} : vector<8x32xi32>
    %c8_i32 = arith.constant 8 : i32
    %26 = vector.broadcast %c8_i32 : i32 to vector<8x1xi32>
    %27 = arith.muli %21, %26 : vector<8x1xi32>
    %28 = vector.broadcast %27 : vector<8x1xi32> to vector<8x32xi32>
    %29 = arith.cmpi slt, %25, %28 : vector<8x32xi32>
    %30 = arith.select %29, %23, %24 : vector<8x32xi1>, vector<8x32xf32>
    %c0_14 = arith.constant 0 : index
    %c0_15 = arith.constant 0 : index
    %31 = vector.load %arg6[%c0_14, %c0_15] : memref<8x32xf32, #tpu.memory_space<vmem>>, vector<8x32xf32>
    tpu.vector_store %arg6[%c0_14, %c0_15], %30 {strides = array<i32>} : memref<8x32xf32, #tpu.memory_space<vmem>>, vector<8x32xf32>,
    return
  }
  func.func @transform_0(%arg0: i32) -> (i32, i32) {
    %c0_i32 = arith.constant 0 : i32
    %c0_i32_0 = arith.constant 0 : i32
    return %arg0, %c0_i32 : i32, i32
  }
  func.func @transform_1(%arg0: i32) -> (i32, i32) {
    %c0_i32 = arith.constant 0 : i32
    %c0_i32_0 = arith.constant 0 : i32
    return %arg0, %c0_i32 : i32, i32
  }
  func.func @transform_2(%arg0: i32) -> (i32, i32) {
    %c0_i32 = arith.constant 0 : i32
    %c0_i32_0 = arith.constant 0 : i32
    %c0_i32_1 = arith.constant 0 : i32
    return %c0_i32, %c0_i32_0 : i32, i32
  }
  func.func @transform_3(%arg0: i32) -> (i32, i32) {
    %c0_i32 = arith.constant 0 : i32
    %c0_i32_0 = arith.constant 0 : i32
    %c0_i32_1 = arith.constant 0 : i32
    return %c0_i32, %c0_i32_0 : i32, i32
  }
  func.func @transform_4(%arg0: i32) -> (i32, i32) {
    %c0_i32 = arith.constant 0 : i32
    %c0_i32_0 = arith.constant 0 : i32
    return %arg0, %c0_i32 : i32, i32
  }
  func.func @transform_5(%arg0: i32) -> (i32, i32) {
    %c0_i32 = arith.constant 0 : i32
    %c0_i32_0 = arith.constant 0 : i32
    return %arg0, %c0_i32 : i32, i32
  }
}

</mosaic_0001>

<bundles_post_ra>
// kernel: attention_layer_forward.1
= control target key start
LH: loop header
LB: loop body
LE: loop exit
PB: predicated region body
PF: predicated region fallthrough
CT: control target
= control target key end

     0   :  { %vm31_vm0 = vcmask 1044480   ;;  %v251_v0 = vmov 0.0|0.0   ;;  %v252_v4 = vmov 0.0   ;;  %vm27_vm1 = vcmask 39936   ;;  %s316_s2 = inlined_call_operand.vmem [shape: f32[40,128], index: 2, kind: input, shape index: {}]   ;;  %s317_s3 = inlined_call_operand.vmem [shape: f32[5,128], index: 3, kind: input, shape index: {}]   ;;  %s318_s1 = inlined_call_operand.vmem [shape: f32[8,5], index: 1, kind: input, shape index: {}]   ;;  %s319_s0 = inlined_call_operand.vmem [shape: f32[8,40], index: 0, kind: input, shape index: {}]   ;;  %s320_s4 = inlined_call_operand.vmem [shape: s32[8,1], index: 4, kind: output, shape index: {0}]   ;;  %s321_s5 = inlined_call_operand.vmem [shape: f32[8,32], index: 5, kind: output, shape index: {1}]  }
   0x1   :  { %238 = vmatprep.subr.bf16.mxu0 %v251_v0  ;;  %v20_v1 = vld [vmem:[%s316_s2] sm:$0xff]  ;;  %v21_v2 = vld [vmem:[%s316_s2 + $0x8] sm:$0xff]  ;;  %v22_v3 = vld [vmem:[%s316_s2 + $0x10] sm:$0xff]  ;;  %220 = vmatprep.subr.mxu1 %v252_v4  ;;  %vm253_vm2 = vmmov 0   ;;  %vm105_vm3 = vcmask 326656   ;;  %v179_v14 = vlaneseq  ;;  %vm191_vm6 = vcmask 7168  }
   0x2   :  { %v239_v5 = vpack.c.bf16 %v21_v2, %v20_v1  ;;  %v23_v6 = vld [vmem:[%s316_s2 + $0x18] sm:$0xff]  ;;  %v26_v7 = vld [vmem:[%s317_s3] sm:$0x1f]  ;;  %222 = vmatprep.mubr.msk.f32.mxu1 %vm253_vm2, %v252_v4  ;;  %235 = vmatprep.mubr.msk.f32.mxu0 %vm253_vm2, %v252_v4  ;;  %vm199_vm7 = vcmask 261120  }
   0x3   :  { %v25_v8 = vld [vmem:[%s318_s1] sm:$0xff]  ;;  %221 = vmatpush3.msk.msra.mxu1 %vm31_vm0, %v26_v7  ;;  %v242_v9 = vpack.c.bf16 %v23_v6, %v22_v3  ;;  %v180_v15 = vand.u32 127, %v179_v14  ;;  %s254_s1 = smov 120  }
   0x4   :  { %240 = vmatpush3.bf16.msra.mxu0 %v239_v5  ;;  %223 = vmatmul.mubr.msk.f32.vlgmr.msra.gmra.mrb[0].mxu1 %vm27_vm1, %v25_v8  ;;  %v24_v10 = vld [vmem:[%s316_s2 + $0x20] sm:$0xff] }
   0x5   :  { %241 = vmatprep.subr.bf16.mxu0 %v251_v0  ;;  %v19_v11 = vld [vmem:[%s319_s0] sm:$0xff]  ;;  %vm181_vm4 = vcmp.lt.s32.totalorder %v180_v15, 5  ;;  %v185_v20 = vcvt.s32.f32 %v180_v15 }
   0x6   :  { %195 = vrot.lane.b32.xlu1 %v19_v11, %s254_s1 }
   0x8   :  { %243 = vmatpush3.bf16.msra.mxu0 %v242_v9 }
   0x9   :  { %233 = vmatprep.subr.mxu0 %v252_v4 }
   0xc   :  { %234 = vmatpush3.msra.mxu0 %v24_v10 }
   0xd   :  { %236 = vmatmul.mubr.msk.f32.vlgmr.msra.gmra.mrb[0].mxu0 %vm105_vm3, %v19_v11 }
  0x78   :  { %v196_v27 = vpop.permute.xlu1 %195 }
  0xd7   :  { %v101_v12 = vpop.f32.mrb[0].mxu1 }
  0xd8   :  { %v224_v13 = vpop.f32.mrb[1].mxu1 }
  0xe0   :  { %v175_v16 = vpop.f32.mrb[0].mxu0 }
  0xe1   :  { %v176_v17 = vadd.f32 %v175_v16, %v101_v12  ;;  %v237_v18 = vpop.f32.mrb[1].mxu0 }
  0xe3   :  { %v182_v19 = vsel %vm181_vm4, %v176_v17, inf }
  0xe4   :  { %183 = vmin.xlane.f32.xlu0 %v182_v19 }
 0x171   :  { %v184_v21 = vpop.xlane.xlu0 %183 }
 0x172   :  { %vm186_vm5 = vcmp.le.f32.partialorder %v182_v19, %v184_v21 }
 0x173   :  { %v187_v22 = vsel %vm186_vm5, %v185_v20, 128.0 }
 0x174   :  { %188 = vmin.xlane.f32.xlu0 %v187_v22 }
 0x201   :  { %v189_v23 = vpop.xlane.xlu0 %188 }
 0x202   :  { %v245_v24 = vtrunc.f32 %v189_v23 }
 0x204   :  { %v246_v25 = vcvt.f32.s32 %v245_v24 }
 0x206   :  { %192 = vst.msk [vmem:[%s320_s4] sm:$0xff] %vm191_vm6, %v246_v25  ;;  %v193_v26 = vmul.u32 8, %v246_v25 }
 0x208   :  { %vm194_vm8 = vcmp.lt.s32.totalorder %v180_v15, %v193_v26 }
 0x209   :  { %v198_v28 = vsel %vm194_vm8, %v19_v11, %v196_v27 }
 0x20a   :  { %200 = vst.msk [vmem:[%s321_s5] sm:$0xff] %vm199_vm7, %v198_v28 }

</bundles_post_ra>
